<compile_context>
chip_gen: v7x
topology: tpu7x:2x2x1
jax: 0.10.0
libtpu: 0.0.40
codegen_flags: <defaults>
</compile_context>

<pallas_src>
import jax
import jax.numpy as jnp
from jax.experimental import pallas as pl
from jax.experimental.pallas import tpu as pltpu


IGNORE_LABEL = 255
_MAX_TILE_PIX = 4096                 # target lane-axis tile (pixels per grid step)
_MAX_BLOCK_BYTES = 4 * 1024 * 1024   # per-buffer cap so 2x-buffered blocks fit scoped VMEM


def _choose_tile_pix(hw, c):
    """Pick the pixel-tile width (lane axis)."""
    # cap so a single f32 (c, TILE) logits block stays under _MAX_BLOCK_BYTES
    cap = max(128, (_MAX_BLOCK_BYTES // (4 * max(c, 1))) // 128 * 128)
    tile = min(_MAX_TILE_PIX, cap)
    if hw <= tile:
        return hw          # full-extent lane dim: always legal regardless of divisibility
    return tile            # multiple of 128; ragged last tile masked in-kernel


def _make_ce_kernel(ignore_label, hw, tile_pix):
    def ce_kernel(logits_ref, target_ref, out_ref):
        x = logits_ref[0].astype(jnp.float32)       # (c, T)  classes on sublanes, pixels on lanes
        t = target_ref[0]                           # (1, T)  int32

        # numerically-stable log-sum-exp over the class (sublane) axis
        m = jnp.max(x, axis=0, keepdims=True)       # (1, T)
        d = x - m                                   # reused for exp() and the gather
        sumexp = jnp.sum(jnp.exp(d), axis=0, keepdims=True)

        # gather the target-class (shifted) logit via one-hot select
        cls = jax.lax.broadcasted_iota(jnp.int32, d.shape, 0)               # (c, T)
        tgt_d = jnp.sum(jnp.where(cls == t, d, 0.0), axis=0, keepdims=True)  # (1, T)

        # loss = lse - x[target] = (m + log(sumexp)) - (m + tgt_d); m cancels
        per_pixel = jnp.log(sumexp) - tgt_d                                  # (1, T)

        # validity: ignore_label / negative labels, plus ragged-last-tile bounds mask
        pix = (pl.program_id(1) * tile_pix
               + jax.lax.broadcasted_iota(jnp.int32, t.shape, 1))            # (1, T)
        valid = (t >= 0) & (t != ignore_label) & (pix < hw)

        per_pixel = jnp.where(valid, per_pixel, 0.0)

        part_sum = jnp.sum(per_pixel)
        part_cnt = jnp.sum(valid.astype(jnp.float32))

        # lane-dense (8,128) partial block: row 0 = partial loss sum, row 1 = valid count
        rows = jax.lax.broadcasted_iota(jnp.int32, (8, 128), 0)
        out_ref[0, 0] = jnp.where(rows == 0, part_sum,
                                  jnp.where(rows == 1, part_cnt, 0.0))

    return ce_kernel


def cross_entropy_2d(predict, target, size_average=True, ignore_label=IGNORE_LABEL):
    """predict: (n, c, h, w) float; target: (n, h, w) int.  Returns scalar loss."""
    # TODO(synk): optional per-class `weight` rescaling is not implemented (weight=None path only).
    n, c, h, w = predict.shape
    assert target.shape == (n, h, w)
    hw = h * w

    # free reshapes only: NCHW stays NCHW in HBM; no transpose / pad / upcast pass
    logits = predict.reshape(n, c, hw)
    tgt = target.reshape(n, 1, hw).astype(jnp.int32)

    tile_pix = _choose_tile_pix(hw, c)
    num_tiles = pl.cdiv(hw, tile_pix)
    grid = (n, num_tiles)

    partials = pl.pallas_call(
        _make_ce_kernel(ignore_label, hw, tile_pix),
        out_shape=jax.ShapeDtypeStruct((n, num_tiles, 8, 128), jnp.float32),
        grid_spec=pltpu.PrefetchScalarGridSpec(
            num_scalar_prefetch=0,
            grid=grid,
            in_specs=[
                pl.BlockSpec((1, c, tile_pix), lambda b, i: (b, 0, i)),
                pl.BlockSpec((1, 1, tile_pix), lambda b, i: (b, 0, i)),
            ],
            out_specs=pl.BlockSpec((1, 1, 8, 128), lambda b, i: (b, i, 0, 0)),
        ),
        compiler_params=pltpu.CompilerParams(
            dimension_semantics=("parallel", "parallel")),
    )(logits, tgt)

    loss_sum = jnp.sum(partials[:, :, 0, 0])
    valid_cnt = jnp.sum(partials[:, :, 1, 0])

    if size_average:
        # torch returns zeros(1) when there are no valid targets
        return jnp.where(valid_cnt > 0, loss_sum / jnp.maximum(valid_cnt, 1.0), 0.0)
    return loss_sum


def _reference_ce(predict, target, ignore_label=IGNORE_LABEL):
    n, c, h, w = predict.shape
    logits = jnp.transpose(predict, (0, 2, 3, 1)).reshape(-1, c).astype(jnp.float32)
    tgt = target.reshape(-1).astype(jnp.int32)
    valid = (tgt >= 0) & (tgt != ignore_label)
    logp = jax.nn.log_softmax(logits, axis=-1)
    picked = jnp.take_along_axis(logp, jnp.clip(tgt, 0, c - 1)[:, None], axis=-1)[:, 0]
    losses = jnp.where(valid, -picked, 0.0)
    cnt = jnp.sum(valid.astype(jnp.float32))
    return jnp.where(cnt > 0, jnp.sum(losses) / jnp.maximum(cnt, 1.0), 0.0)


if __name__ == "__main__":
    key = jax.random.PRNGKey(0)
    k1, k2, k3 = jax.random.split(key, 3)

    n, c, h, w = 2, 4, 16, 16
    predict = jax.random.normal(k1, (n, c, h, w), dtype=jnp.float32)
    target = jax.random.randint(k2, (n, h, w), 0, c, dtype=jnp.int32)
    # sprinkle some ignore_label pixels to exercise the mask
    ignore_mask = jax.random.bernoulli(k3, 0.2, (n, h, w))
    target = jnp.where(ignore_mask, IGNORE_LABEL, target)

    loss = cross_entropy_2d(predict, target, size_average=True, ignore_label=IGNORE_LABEL)
    loss = jax.block_until_ready(loss)

    ref = jax.block_until_ready(_reference_ce(predict, target))
    assert jnp.allclose(loss, ref, atol=1e-5, rtol=1e-5), (loss, ref)

    print("KERNEL_OK")
</pallas_src>

<mosaic_0001>
module attributes {stable_mosaic.version = 11 : i64} {
  func.func @ce_kernel(%arg0: i32, %arg1: i32, %arg2: memref<1x4x256xf32, #tpu.memory_space<vmem>>, %arg3: memref<1x1x256xi32, #tpu.memory_space<vmem>>, %arg4: memref<1x1x8x128xf32, #tpu.memory_space<vmem>>) attributes {dimension_semantics = [#tpu.dimension_semantics<parallel>, #tpu.dimension_semantics<parallel>], iteration_bounds = array<i64: 2, 1>, scalar_prefetch = 0 : i64, scratch_operands = 0 : i64, tpu.core_type = #tpu.core_type<tc>, window_params = [{transform_indices = @transform_0, window_bounds = array<i64: 1, 4, 256>}, {transform_indices = @transform_1, window_bounds = array<i64: 1, 1, 256>}, {transform_indices = @transform_2, window_bounds = array<i64: 1, 1, 8, 128>}]} {
    %c0 = arith.constant 0 : index
    %c0_0 = arith.constant 0 : index
    %c0_1 = arith.constant 0 : index
    %0 = vector.load %arg2[%c0, %c0_0, %c0_1] : memref<1x4x256xf32, #tpu.memory_space<vmem>>, vector<1x4x256xf32>
    %1 = vector.shape_cast %0 : vector<1x4x256xf32> to vector<4x256xf32>
    %c0_2 = arith.constant 0 : index
    %c0_3 = arith.constant 0 : index
    %c0_4 = arith.constant 0 : index
    %2 = vector.load %arg3[%c0_2, %c0_3, %c0_4] : memref<1x1x256xi32, #tpu.memory_space<vmem>>, vector<1x1x256xi32>
    %3 = vector.shape_cast %2 : vector<1x1x256xi32> to vector<1x256xi32>
    %cst = arith.constant dense<0xFF800000> : vector<256xf32>
    %4 = vector.multi_reduction <maximumf>, %1, %cst [0] : vector<4x256xf32> to vector<256xf32>
    %5 = vector.shape_cast %4 : vector<256xf32> to vector<1x256xf32>
    %6 = vector.broadcast %5 : vector<1x256xf32> to vector<4x256xf32>
    %7 = arith.subf %1, %6 : vector<4x256xf32>
    %8 = math.exp %7 : vector<4x256xf32>
    %cst_5 = arith.constant dense<0.000000e+00> : vector<256xf32>
    %9 = vector.multi_reduction <add>, %8, %cst_5 [0] : vector<4x256xf32> to vector<256xf32>
    %10 = vector.shape_cast %9 : vector<256xf32> to vector<1x256xf32>
    %11 = tpu.iota {dimensions = array<i32: 0>} : vector<4x256xi32>
    %12 = vector.broadcast %3 : vector<1x256xi32> to vector<4x256xi32>
    %13 = arith.cmpi eq, %11, %12 : vector<4x256xi32>
    %cst_6 = arith.constant 0.000000e+00 : f32
    %14 = vector.broadcast %cst_6 : f32 to vector<4x256xf32>
    %15 = arith.select %13, %7, %14 : vector<4x256xi1>, vector<4x256xf32>
    %cst_7 = arith.constant dense<0.000000e+00> : vector<256xf32>
    %16 = vector.multi_reduction <add>, %15, %cst_7 [0] : vector<4x256xf32> to vector<256xf32>
    %17 = vector.shape_cast %16 : vector<256xf32> to vector<1x256xf32>
    %18 = math.log %10 : vector<1x256xf32>
    %19 = arith.subf %18, %17 : vector<1x256xf32>
    %c256_i32 = arith.constant 256 : i32
    %20 = arith.muli %arg1, %c256_i32 : i32
    %21 = tpu.iota {dimensions = array<i32: 1>} : vector<1x256xi32>
    %22 = vector.broadcast %20 : i32 to vector<1x256xi32>
    %23 = arith.addi %22, %21 : vector<1x256xi32>
    %c0_i32 = arith.constant 0 : i32
    %24 = vector.broadcast %c0_i32 : i32 to vector<1x256xi32>
    %25 = arith.cmpi sge, %3, %24 : vector<1x256xi32>
    %c255_i32 = arith.constant 255 : i32
    %26 = vector.broadcast %c255_i32 : i32 to vector<1x256xi32>
    %27 = arith.cmpi ne, %3, %26 : vector<1x256xi32>
    %28 = arith.andi %25, %27 : vector<1x256xi1>
    %c256_i32_8 = arith.constant 256 : i32
    %29 = vector.broadcast %c256_i32_8 : i32 to vector<1x256xi32>
    %30 = arith.cmpi slt, %23, %29 : vector<1x256xi32>
    %31 = arith.andi %28, %30 : vector<1x256xi1>
    %cst_9 = arith.constant 0.000000e+00 : f32
    %32 = vector.broadcast %cst_9 : f32 to vector<1x256xf32>
    %33 = arith.select %31, %19, %32 : vector<1x256xi1>, vector<1x256xf32>
    %34 = vector.shape_cast %33 : vector<1x256xf32> to vector<1x1x256xf32>
    %cst_10 = arith.constant dense<0.000000e+00> : vector<1xf32>
    %35 = vector.multi_reduction <add>, %34, %cst_10 [1, 2] : vector<1x1x256xf32> to vector<1xf32>
    %36 = vector.shape_cast %35 : vector<1xf32> to vector<1x1x1xf32>
    %37 = vector.extract %36[0, 0, 0] : f32 from vector<1x1x1xf32>
    %38 = arith.extui %31 : vector<1x256xi1> to vector<1x256xi32>
    %39 = arith.sitofp %38 : vector<1x256xi32> to vector<1x256xf32>
    %40 = vector.shape_cast %39 : vector<1x256xf32> to vector<1x1x256xf32>
    %cst_11 = arith.constant dense<0.000000e+00> : vector<1xf32>
    %41 = vector.multi_reduction <add>, %40, %cst_11 [1, 2] : vector<1x1x256xf32> to vector<1xf32>
    %42 = vector.shape_cast %41 : vector<1xf32> to vector<1x1x1xf32>
    %43 = vector.extract %42[0, 0, 0] : f32 from vector<1x1x1xf32>
    %44 = tpu.iota {dimensions = array<i32: 0>} : vector<8x128xi32>
    %c0_i32_12 = arith.constant 0 : i32
    %45 = vector.broadcast %c0_i32_12 : i32 to vector<8x128xi32>
    %46 = arith.cmpi eq, %44, %45 : vector<8x128xi32>
    %c1_i32 = arith.constant 1 : i32
    %47 = vector.broadcast %c1_i32 : i32 to vector<8x128xi32>
    %48 = arith.cmpi eq, %44, %47 : vector<8x128xi32>
    %cst_13 = arith.constant 0.000000e+00 : f32
    %49 = vector.broadcast %43 : f32 to vector<8x128xf32>
    %50 = vector.broadcast %cst_13 : f32 to vector<8x128xf32>
    %51 = arith.select %48, %49, %50 : vector<8x128xi1>, vector<8x128xf32>
    %52 = vector.broadcast %37 : f32 to vector<8x128xf32>
    %53 = arith.select %46, %52, %51 : vector<8x128xi1>, vector<8x128xf32>
    %c0_14 = arith.constant 0 : index
    %c0_15 = arith.constant 0 : index
    %c0_16 = arith.constant 0 : index
    %c0_17 = arith.constant 0 : index
    %54 = vector.load %arg4[%c0_14, %c0_15, %c0_16, %c0_17] : memref<1x1x8x128xf32, #tpu.memory_space<vmem>>, vector<1x1x8x128xf32>
    %55 = vector.shape_cast %54 : vector<1x1x8x128xf32> to vector<8x128xf32>
    %56 = vector.shape_cast %53 : vector<8x128xf32> to vector<1x1x8x128xf32>
    tpu.vector_store %arg4[%c0_14, %c0_15, %c0_16, %c0_17], %56 {strides = array<i32>} : memref<1x1x8x128xf32, #tpu.memory_space<vmem>>, vector<1x1x8x128xf32>,
    return
  }
  func.func @transform_0(%arg0: i32, %arg1: i32) -> (i32, i32, i32) {
    %c0_i32 = arith.constant 0 : i32
    %c0_i32_0 = arith.constant 0 : i32
    return %arg0, %c0_i32, %arg1 : i32, i32, i32
  }
  func.func @transform_1(%arg0: i32, %arg1: i32) -> (i32, i32, i32) {
    %c0_i32 = arith.constant 0 : i32
    %c0_i32_0 = arith.constant 0 : i32
    return %arg0, %c0_i32, %arg1 : i32, i32, i32
  }
  func.func @transform_2(%arg0: i32, %arg1: i32) -> (i32, i32, i32, i32) {
    %c0_i32 = arith.constant 0 : i32
    %c0_i32_0 = arith.constant 0 : i32
    %c0_i32_1 = arith.constant 0 : i32
    return %arg0, %arg1, %c0_i32, %c0_i32_0 : i32, i32, i32, i32
  }
}

</mosaic_0001>

<bundles_post_ra>
// kernel: tpu_custom_call.1
= control target key start
LH: loop header
LB: loop body
LE: loop exit
PB: predicated region body
PF: predicated region fallthrough
CT: control target
= control target key end

     0   :  { %7 = vsyncpa [#allocation3], 0  ;;  %s1047_s0 = inlined_call_operand.hbm [shape: f32[2,4,256], index: 0, kind: input, shape index: {}]   ;;  %s1048_s1 = inlined_call_operand.hbm [shape: s32[2,1,256], index: 1, kind: input, shape index: {}]   ;;  %s1049_s2 = inlined_call_operand.hbm [shape: f32[2,1,8,128], index: 2, kind: output, shape index: {}]  }
   0x1   :  { %9 = vsyncpa [#allocation3 + $0x1], 0 }
   0x2   :  { %10 = vsyncpa [#allocation6], 0 }
   0x3   :  { %12 = vsyncpa [#allocation6 + $0x1], 0 }
   0x4   :  { %13 = vsyncpa [#allocation4], 0 }
   0x5   :  { %15 = vsyncpa [#allocation4 + $0x1], 0  ;;  %s803_s9 = smov 0   ;;  %s805_s10 = smov 0  }
   0x6   :  { %s807_s11 = smov 0   ;;  %s809_s12 = smov 0  }
   0x7   :  { %s811_s13 = smov 0   ;;  %s813_s14 = smov 0  }
   0x8 LB: > { %s532_s15 = sadd.s32 4294967295, %s780_s14   ;;  %s533_s16 = sadd.s32 4294967294, %s780_s14   ;;  %s780_s14 = sphi %s813_s14, %s21_s14   ;;  %s776_s13 = sphi %s811_s13, %s1069_s13   ;;  %s772_s12 = sphi %s809_s12, %s1068_s12   ;;  %s768_s11 = sphi %s807_s11, %s1067_s11   ;;  %s764_s10 = sphi %s805_s10, %s1066_s10   ;;  %s760_s9 = sphi %s803_s9, %s1065_s9  }
   0x9   : > { %s33_s17 = sadd.s32 1, %s776_s13  ;;  %s42_s18 = sadd.s32 1, %s768_s11 }
   0xa   : > { %p35_p0 = scmp.ge.s32.totalorder %s33_s17, 2  ;;  %p49_p1 = scmp.ne.s32.totalorder %s768_s11, %s764_s10 }
   0xb   : > { %p50_p2 = scmp.eq.s32.totalorder %s780_s14, 0  ;;  %p55_p3 = scmp.ne.s32.totalorder %s764_s10, %s760_s9 }
   0xc   : > { %s1071_s17 = smov (%p35_p0, %s33_s17), 0  ;;  %p56_p5 = scmp.eq.s32.totalorder %s532_s15, 0 }
   0xd   : > { %p844_p4 = por %p50_p2, %p49_p1  ;;  %s37_s20 = ssub.s32 %s776_s13, %s1071_s17 }
   0xe   : > { %p109_p6 = scmp.eq.s32.totalorder %s532_s15, 1  ;;  %p40_p7 = scmp.eq.s32.totalorder %s37_s20, 0 }
   0xf   : > { %p850_p8 = por %p56_p5, %p55_p3  ;;  %p115_p10 = scmp.eq.s32.totalorder %s533_s16, 1 }
  0x10   : > { %p854_p9 = por %p109_p6, %p49_p1  ;;  %p574_p13 = scmp.lt.s32.totalorder %s780_s14, 2 }
  0x11   : > { %s1053_s21 = scalar_select %p850_p8, 1, 0 }
  0x12   : > { %s1054_s22 = scalar_select %p854_p9, 1, 0 }
  0x13   : > { %s859_s23 = scalar_select %p40_p7, %s768_s11, %s42_s18  }
  0x14   : > { %p861_p11 = por %p115_p10, %p55_p3  ;;  %s868_s25 = sand.u32 1, %s768_s11  }
  0x15   : > { %s536_s26 = sshll.u32 %s868_s25, 3  ;;  %s551_s27 = sshll.u32 %s776_s13, 7 }
  0x16   : > { %s1055_s24 = scalar_select %p861_p11, 1, 0 }
  0x17   : > { %s875_s30 = scalar_lea.hbm %s1047_s0, %s551_s27  ;;  %s139_s3 = scalar_lea.vmem [#allocation2], %s536_s26 }
  0x18   : > { %s149_s4 = sshll.u32 %s139_s3, 4  ;;  %p881_p0 = pnand %p574_p13, %p844_p4  ;;  %s877_s4 = int_to_ptr.vmem [resolvable:$true] %s149_s4 }
  0x19   : > { %s136_s6 = scalar_lea.sflag [#allocation3], %s868_s25  ;;  %s634_s7 = scalar_lea.hbm %s875_s30, 128 }
  0x1a   : > { %p635_p3 = scmp.ne.s32.totalorder %s875_s30, %s634_s7  ;;  %p636_p5 = pneg %p881_p0 }
  0x1b   : > { %s639_s16 = scalar_lea.hbm %s1047_s0, 256  ;;  %p640_p4 = scmp.lt.u32.totalorder %s875_s30, %s1047_s0 }
  0x1c   : > { %p637_p6 = pnand %p636_p5, %p635_p3  ;;  %p641_p10 = scmp.lt.u32.totalorder %s639_s16, %s634_s7 }
  0x1d   : > { %p643_p12 = scmp.lt.u32.totalorder %s634_s7, %s875_s30 }
  0x1e   : > { %p638_p7 = pneg %p637_p6  ;;  %p642_p13 = por %p641_p10, %p640_p4 }
  0x20   : > { %p644_p1 = por %p643_p12, %p642_p13 }
  0x22   : > { %p645_p2 = pnand %p644_p1, %p638_p7 }
  0x24   : > { %648 = shalt.err (!%p645_p2)
}
  0x25   : > { %s649_s20 = scalar_lea.vmem %s877_s4, 128  ;;  %s782_s26 = smov [#allocation2]  }
  0x26   : > { %p650_p3 = scmp.ne.s32.totalorder %s877_s4, %s649_s20  ;;  %s654_s27 = sshll.u32 %s782_s26, 4  ;;  %s655_s27 = int_to_ptr.vmem [resolvable:$false] %s654_s27 }
  0x27   : > { %s656_s28 = scalar_lea.vmem %s655_s27, 256  ;;  %p657_p9 = scmp.lt.s32.totalorder %s877_s4, %s655_s27 }
  0x28   : > { %p652_p6 = pnand %p650_p3, %p636_p5  ;;  %p658_p4 = scmp.lt.s32.totalorder %s656_s28, %s649_s20 }
  0x2a   : > { %p653_p11 = pneg %p652_p6  ;;  %p659_p10 = por %p658_p4, %p657_p9 }
  0x2c   : > { %p660_p12 = pnand %p659_p10, %p653_p11 }
  0x2e   : > { %663 = shalt.err (!%p660_p12)
}
  0x2f   : > { %566 = dma.hbm_to_vmem [thread:$0]  (!%p881_p0), %s875_s30, 128, %s877_s4, %s136_s6  }
  0x30   : > { %p1057_p1 = scmp.lt.s32.totalorder %s780_s14, 3  ;;  %p1058_p2 = scmp.ge.s32.totalorder %s780_s14, 1 }
  0x31   : > { %s539_s3 = sshll.u32 %s868_s25, 1  ;;  %s552_s7 = sshll.u32 %s776_s13, 5 }
  0x32   : > { %p917_p7 = pnand %p1058_p2, %p1057_p1  ;;  %s926_s16 = scalar_lea.hbm %s1048_s1, %s552_s7 }
  0x33   : > { %s160_s18 = scalar_lea.vmem [#allocation5], %s539_s3  ;;  %s157_s30 = scalar_lea.sflag [#allocation6], %s868_s25 }
  0x34   : > { %s1059_s29 = scalar_select %p917_p7, 1, 0 }
  0x35   : > { %s170_s19 = sshll.u32 %s160_s18, 4  ;;  %s664_s4 = scalar_lea.hbm %s926_s16, 32  ;;  %s171_s19 = int_to_ptr.vmem [resolvable:$true] %s170_s19 }
  0x36   : > { %p665_p9 = scmp.ne.s32.totalorder %s926_s16, %s664_s4  ;;  %s669_s26 = scalar_lea.hbm %s1048_s1, 64 }
  0x37   : > { %p670_p3 = scmp.lt.u32.totalorder %s926_s16, %s1048_s1  ;;  %p671_p6 = scmp.lt.u32.totalorder %s669_s26, %s664_s4 }
  0x38   : > { %p667_p11 = pnand %p665_p9, %p636_p5  ;;  %p673_p10 = scmp.lt.u32.totalorder %s664_s4, %s926_s16 }
  0x39   : > { %p672_p4 = por %p671_p6, %p670_p3 }
  0x3a   : > { %p668_p13 = pneg %p667_p11 }
  0x3b   : > { %p674_p12 = por %p673_p10, %p672_p4 }
  0x3d   : > { %p675_p1 = pnand %p674_p12, %p668_p13 }
  0x3f   : > { %678 = shalt.err (!%p675_p1)
}
  0x40   : > { %s679_s25 = scalar_lea.vmem %s171_s19, 32  ;;  %s783_s3 = smov [#allocation5]  }
  0x41   : > { %p680_p2 = scmp.ne.s32.totalorder %s171_s19, %s679_s25  ;;  %s684_s7 = sshll.u32 %s783_s3, 4  ;;  %s685_s7 = int_to_ptr.vmem [resolvable:$false] %s684_s7 }
  0x42   : > { %s686_s8 = scalar_lea.vmem %s685_s7, 64  ;;  %p687_p8 = scmp.lt.s32.totalorder %s171_s19, %s685_s7 }
  0x43   : > { %p682_p9 = pnand %p680_p2, %p636_p5  ;;  %p688_p7 = scmp.lt.s32.totalorder %s686_s8, %s679_s25 }
  0x45   : > { %p683_p11 = pneg %p682_p9  ;;  %p689_p3 = por %p688_p7, %p687_p8 }
  0x47   : > { %p690_p6 = pnand %p689_p3, %p683_p11 }
  0x49   : > { %693 = shalt.err (!%p690_p6)
}
  0x4a   : > { %569 = dma.hbm_to_vmem [thread:$0]  (!%p881_p0), %s926_s16, 32, %s171_s19, %s157_s30  }
  0x4b   : > { %p1060_p13 = scmp.ne.s32.totalorder %s1059_s29, 0 }
  0x4c   : > { %s951_s15 = sand.u32 (!%p1060_p13), 1, %s764_s10   ;;  %p1061_p8 = scmp.ne.s32.totalorder (!%p1060_p13), %s1053_s21, 0 }
  0x4d   : > { %179 = sbr.rel (%p1060_p13) target bundleno = 388 (0x184), region = 28  ;;  %s543_s18 = sshll.u32 (!%p1060_p13), %s951_s15, 3 }
  0x4e   : > { %s182_s4 = scalar_lea.sflag (!%p1060_p13), [#allocation3], %s951_s15  ;;  %s185_s6 = scalar_lea.vmem (!%p1060_p13), [#allocation2], %s543_s18 }
  0x54   : > { %747 = dma.done.wait (%p1061_p8), %s182_s4, 128  }
  0x55   : > { %749 = vsyncadd (%p1061_p8), %s182_s4, 4294967168  ;;  %s544_s5 = sshll.u32 %s951_s15, 1  ;;  %s191_s29 = scalar_lea.sflag [#allocation6], %s951_s15 }
  0x56   : > { %s194_s16 = scalar_lea.vmem [#allocation5], %s544_s5 }
  0x57   : > { %751 = dma.done.wait (%p1061_p8), %s191_s29, 32  }
  0x58   : > { %753 = vsyncadd (%p1061_p8), %s191_s29, 4294967264  ;;  %vm227_vm0 = vcmask 1043456   ;;  %v222_v0 = vld [vmem:[%s185_s6] sm:$0xff]  ;;  %v266_v13 = vlaneseq  ;;  %v223_v21 = vld [vmem:[%s194_s16] sm:$0x3]  ;;  %v785_v58 = vmov 1  }
  0x59   : > { %v225_v1 = vcombine.high %v222_v0, %v222_v0  ;;  %v228_v2 = vsel %vm227_vm0, %v222_v0, -inf  ;;  %v784_v46 = vmov 1966171168   ;;  %v317_v59 = vcombine.low %v785_v58, %v785_v58  ;;  %s548_s21 = sshll.u32 %s772_s12, 7  ;;  %s219_s30 = scalar_lea.vmem [#allocation7], %s543_s18 }
  0x5a   : > { %v229_v3 = vrot.slane %v228_v2, 4  ;;  %v969_v17 = vshrl.u32 %v266_v13, 7  ;;  %v319_v47 = vunpack.c.l.s4 %v784_v46  ;;  %vm310_vm3 = vcmp.ge.s32.totalorder %v223_v21, 0  ;;  %s424_s20 = sshll.u32 %s219_s30, 4  ;;  %s998_s25 = scalar_lea.hbm %s1049_s2, %s548_s21  ;;  %s1000_s20 = int_to_ptr.vmem [resolvable:$true] %s424_s20 }
  0x5b   : > { %v235_v4 = vsel %vm227_vm0, %v225_v1, -inf  ;;  %vm311_vm4 = vcmp.ne.s32.totalorder %v223_v21, 255  ;;  %vm364_vm8 = vcmask 1040384   ;;  %s410_s12 = scalar_lea.sflag [#allocation4], %s951_s15  ;;  %s694_s3 = scalar_lea.vmem %s1000_s20, 128 }
  0x5c   : > { %v230_v5 = vmax.f32 %v228_v2, %v229_v3  ;;  %v236_v6 = vrot.slane %v235_v4, 4  ;;  %v972_v20 = vsub.s32 0, %v969_v17  ;;  %v975_v23 = vsub.s32 1, %v969_v17  ;;  %vm312_vm5 = vmand %vm310_vm3, %vm311_vm4  ;;  %p695_p0 = scmp.ne.s32.totalorder %s1000_s20, %s694_s3  ;;  %p1062_p5 = scmp.ne.s32.totalorder %s1054_s22, 0 }
  0x5d   : > { %v320_v54 = vunpack.c.0.s8 %v319_v47  ;;  %vm403_vm9 = vcmp.eq.s32.totalorder %v969_v17, 1  ;;  %vm402_vm10 = vcmp.eq.s32.totalorder %v969_v17, 0  ;;  %s787_s7 = smov [#allocation7]  }
  0x5e   : > { %v231_v7 = vrot.slane %v230_v5, 2  ;;  %v237_v8 = vmax.f32 %v235_v4, %v236_v6  ;;  %v271_v24 = vrot.slane %v223_v21, %v972_v20  ;;  %v275_v25 = vrot.slane %v223_v21, %v975_v23  ;;  %p696_p7 = pnand %p695_p0, %p1062_p5  ;;  %s698_s8 = sshll.u32 %s787_s7, 4  ;;  %s699_s8 = int_to_ptr.vmem [resolvable:$false] %s698_s8 }
  0x5f   : > { %v323_v60 = vsub.s32 %v320_v54, %v969_v17  ;;  %s700_s18 = scalar_lea.vmem %s699_s8, 256  ;;  %p701_p10 = scmp.lt.s32.totalorder %s1000_s20, %s699_s8 }
  0x60   : > { %v232_v9 = vmax.f32 %v230_v5, %v231_v7  ;;  %v238_v10 = vrot.slane %v237_v8, 2  ;;  %vm276_vm1 = vcmp.eq.s32.totalorder %v969_v17, %v271_v24  ;;  %vm277_vm2 = vcmp.eq.s32.totalorder %v969_v17, %v275_v25  ;;  %p697_p4 = pneg %p696_p7  ;;  %p702_p12 = scmp.lt.s32.totalorder %s700_s18, %s694_s3 }
  0x61   : > { %v324_v63 = vrot.slane %v317_v59, %v323_v60 }
  0x62   : > { %v233_v11 = vrot.slane %v232_v9, 1  ;;  %v239_v12 = vmax.f32 %v237_v8, %v238_v10  ;;  %p703_p1 = por %p702_p12, %p701_p10 }
  0x63   : > { %v331_v4 = vrot.slane %v324_v63, %v323_v60 }
  0x64   : > { %v234_v14 = vmax.f32 %v232_v9, %v233_v11  ;;  %v240_v15 = vrot.slane %v239_v12, 1  ;;  %v786_v11 = vmov 0.0   ;;  %p704_p2 = pnand %p703_p1, %p697_p4 }
  0x65   : > { %vm332_vm6 = vcmp.ne.s32.totalorder %v331_v4, 0 }
  0x66   : > { %v241_v16 = vmax.f32 %v239_v12, %v240_v15  ;;  %vm333_vm7 = vmand %vm312_vm5, %vm332_vm6 }
  0x67   : > { %v546_v12 = vsel %vm333_vm7, 1.0, %v786_v11 }
  0x68   : > { %v244_v18 = vcombine.low %v234_v14, %v241_v16  ;;  %v383_v14 = vrot.slane %v546_v12, %v972_v20  ;;  %v387_v15 = vrot.slane %v546_v12, %v975_v23 }
  0x6a   : > { %v246_v19 = vsub.f32 %v222_v0, %v244_v18  ;;  %v390_v24 = vsel %vm364_vm8, %v383_v14, 0.0  ;;  %v391_v25 = vsel %vm364_vm8, %v387_v15, 0.0 }
  0x6c   : > { %v247_v22 = vmul.f32 1.442695, %v246_v19  ;;  %v279_v26 = vcombine.high %v246_v19, %v246_v19  ;;  %v281_v27 = vsel %vm276_vm1, %v246_v19, 0.0 }
  0x6d   : > { %v283_v30 = vsel %vm227_vm0, %v281_v27, 0.0  ;;  %v392_v27 = vadd.f32 %v391_v25, %v390_v24 }
  0x6e   : > { %628 = vpow2.f32 %v247_v22  ;;  %v282_v28 = vsel %vm277_vm2, %v279_v26, 0.0  ;;  %v284_v36 = vrot.slane %v283_v30, 4 }
  0x6f   : > { %v290_v34 = vsel %vm227_vm0, %v282_v28, 0.0 }
  0x70   : > { %v291_v39 = vrot.slane %v290_v34, 4  ;;  %v285_v42 = vadd.f32 %v284_v36, %v283_v30 }
  0x72   : > { %v292_v45 = vadd.f32 %v291_v39, %v290_v34  ;;  %v286_v50 = vrot.slane %v285_v42, 2 }
  0x74   : > { %v293_v53 = vrot.slane %v292_v45, 2  ;;  %v287_v56 = vadd.f32 %v286_v50, %v285_v42 }
  0x76   : > { %v294_v57 = vadd.f32 %v293_v53, %v292_v45  ;;  %v288_v61 = vrot.slane %v287_v56, 1 }
  0x78   : > { %v629_v29 = vpop.eup %628  ;;  %v295_v62 = vrot.slane %v294_v57, 1  ;;  %v289_v0 = vadd.f32 %v288_v61, %v287_v56 }
  0x79   : > { %v250_v31 = vcombine.high %v629_v29, %v629_v29  ;;  %v252_v32 = vsel %vm227_vm0, %v629_v29, 0.0 }
  0x7a   : > { %v253_v33 = vrot.slane %v252_v32, 4  ;;  %v296_v2 = vadd.f32 %v295_v62, %v294_v57 }
  0x7b   : > { %v259_v35 = vsel %vm227_vm0, %v250_v31, 0.0 }
  0x7c   : > { %v254_v37 = vadd.f32 %v253_v33, %v252_v32  ;;  %v260_v38 = vrot.slane %v259_v35, 4 }
  0x7e   : > { %v255_v40 = vrot.slane %v254_v37, 2  ;;  %v261_v41 = vadd.f32 %v260_v38, %v259_v35 }
  0x80   : > { %v256_v43 = vadd.f32 %v255_v40, %v254_v37  ;;  %v262_v44 = vrot.slane %v261_v41, 2 }
  0x82   : > { %v257_v48 = vrot.slane %v256_v43, 1  ;;  %v263_v49 = vadd.f32 %v262_v44, %v261_v41 }
  0x84   : > { %v258_v51 = vadd.f32 %v257_v48, %v256_v43  ;;  %v264_v52 = vrot.slane %v263_v49, 1 }
  0x86   : > { %v265_v55 = vadd.f32 %v264_v52, %v263_v49  ;;  %630 = vlog2.f32 %v258_v51 }
  0x88   : > { %632 = vlog2.f32 %v265_v55 }
  0x90   : > { %v631_v1 = vpop.eup %630 }
  0x91   : > { %v298_v3 = vmul.f32 0.6931472, %v631_v1 }
  0x92   : > { %v633_v5 = vpop.eup %632 }
  0x93   : > { %v300_v6 = vmul.f32 0.6931472, %v633_v5  ;;  %v301_v7 = vsub.f32 %v298_v3, %v289_v0 }
  0x95   : > { %v302_v8 = vsub.f32 %v300_v6, %v296_v2 }
  0x97   : > { %v336_v9 = vcombine.low %v301_v7, %v302_v8 }
  0x99   : > { %v343_v10 = vrot.slane %v336_v9, %v323_v60 }
  0x9b   : > { %v350_v13 = vrot.slane %v343_v10, %v323_v60 }
  0x9d   : > { %v352_v16 = vsel %vm333_vm7, %v350_v13, 0.0 }
  0x9e   : > { %v357_v18 = vrot.slane %v352_v16, %v972_v20  ;;  %v361_v19 = vrot.slane %v352_v16, %v975_v23 }
  0xa0   : > { %v365_v21 = vsel %vm364_vm8, %v357_v18, 0.0  ;;  %v366_v22 = vsel %vm364_vm8, %v361_v19, 0.0 }
  0xa1   : > { %v367_v26 = vadd.f32 %v366_v22, %v365_v21 }
  0xa3   : > { %368 = vadd.xlane.f32.xlu0 %v367_v26 }
  0xa7   : > { %393 = vadd.xlane.f32.xlu0 %v392_v27 }
 0x130   : > { %v369_v28 = vpop.xlane.xlu0 %368 }
 0x131   : > { %v370_v29 = vrot.slane %v369_v28, 4 }
 0x133   : > { %v371_v30 = vadd.f32 %v370_v29, %v369_v28 }
 0x134   : > { %v394_v31 = vpop.xlane.xlu0 %393 }
 0x135   : > { %v372_v32 = vrot.slane %v371_v30, 2  ;;  %v395_v33 = vrot.slane %v394_v31, 4 }
 0x137   : > { %v396_v34 = vadd.f32 %v395_v33, %v394_v31  ;;  %v373_v20 = vadd.f32 %v372_v32, %v371_v30 }
 0x139   : > { %v397_v35 = vrot.slane %v396_v34, 2  ;;  %v374_v23 = vrot.slane %v373_v20, 1 }
 0x13b   : > { %v398_v36 = vadd.f32 %v397_v35, %v396_v34  ;;  %v375_v37 = vadd.f32 %v374_v23, %v373_v20 }
 0x13d   : > { %553 = vpush %v375_v37  ;;  %v399_v38 = vrot.slane %v398_v36, 1 }
 0x13f   : > { %v400_v39 = vadd.f32 %v399_v38, %v398_v36 }
 0x141   : > { %555 = vpush %v400_v39 }
 0x16e   : > { %s554_s19 = spop %553 }
 0x16f   : > { %v406_v41 = vstv %s554_s19 }
 0x172   : > { %s556_s26 = spop %555 }
 0x173   : > { %v404_v40 = vstv %s556_s26 }
 0x174   : > { %v405_v42 = vsel %vm403_vm9, %v404_v40, 0.0 }
 0x175   : > { %v407_v43 = vsel %vm402_vm10, %v406_v41, %v405_v42 }
 0x176   : > { %408 = vst [vmem:[%s219_s30] sm:$0xff] %v407_v43 }
 0x177   : > { %707 = shalt.err (!%p704_p2)
}
 0x178   : > { %s708_s15 = scalar_lea.hbm %s998_s25, 128  ;;  %s712_s5 = scalar_lea.hbm %s1049_s2, 256 }
 0x179   : > { %p709_p9 = scmp.ne.s32.totalorder %s998_s25, %s708_s15  ;;  %p713_p6 = scmp.lt.u32.totalorder %s998_s25, %s1049_s2 }
 0x17a   : > { %p714_p13 = scmp.lt.u32.totalorder %s712_s5, %s708_s15  ;;  %p716_p0 = scmp.lt.u32.totalorder %s708_s15, %s998_s25 }
 0x17b   : > { %p710_p11 = pnand %p709_p9, %p1062_p5 }
 0x17c   : > { %p715_p8 = por %p714_p13, %p713_p6 }
 0x17d   : > { %p711_p3 = pneg %p710_p11 }
 0x17e   : > { %p717_p7 = por %p716_p0, %p715_p8 }
 0x180   : > { %p718_p4 = pnand %p717_p7, %p711_p3 }
 0x182   : > { %721 = shalt.err (!%p718_p4)
}
 0x183   : > { %561 = dma.vmem_to_hbm [thread:$0]  (%p1062_p5), %s1000_s20, 128, %s998_s25, %s410_s12  }
 0x184 PF: > { %s436_s21 = sand.u32 1, %s760_s9   ;;  %p1063_p10 = scmp.ne.s32.totalorder %s1055_s24, 0 }
 0x185   : > { %p1064_p12 = scmp.ge.s32.totalorder %s780_s14, 2  ;;  %s437_s19 = scalar_lea.sflag [#allocation4], %s436_s21 }
 0x187   : > { %p571_p1 = pnand %p1064_p12, %p1063_p10 }
 0x189   : > { %755 = dma.done.wait (!%p571_p1), %s437_s19, 128  }
 0x18a   : > { %757 = vsyncadd (!%p571_p1), %s437_s19, 4294967168  ;;  %s21_s14 = sadd.s32 1, %s780_s14   ;;  %s1065_s9 = smov %s764_s10 }
 0x18b   : > { %p18_p2 = scmp.ge.s32.totalorder %s21_s14, 4   ;;  %s1066_s10 = smov %s768_s11 }
 0x18c   : > { %s1067_s11 = smov %s859_s23  ;;  %s1068_s12 = smov %s776_s13 }
 0x18d   : > { %s1069_s13 = smov %s1071_s17  ;;  %20 = sbr.rel (!%p18_p2) target bundleno = 8 (0x8), region = 86 }
 0x194   :  { %442 = vsyncpa [#allocation3], 1 }
 0x195   :  { %444 = vsyncpa [#allocation3 + $0x1], 1 }
 0x196   :  { %445 = vsyncpa [#allocation6], 1 }
 0x197   :  { %447 = vsyncpa [#allocation6 + $0x1], 1 }
 0x198   :  { %448 = vsyncpa [#allocation4], 1 }
 0x199   :  { %450 = vsyncpa [#allocation4 + $0x1], 1 }

</bundles_post_ra>
